<compile_context>
chip_gen: v7x
topology: tpu7x:2x2x1
jax: 0.10.0
libtpu: 0.0.40
codegen_flags: <defaults>
</compile_context>

<pallas_src>
import jax
import jax.numpy as jnp
from jax.experimental import pallas as pl
from jax.experimental.pallas import tpu as pltpu


def _round_up(x, m):
    return ((x + m - 1) // m) * m


def merge_layer_kernel(x1_ref, x2_ref, w1a_ref, w1b_ref, b1_ref, w2_ref, b2_ref, o_ref):
    # fc1 on the (virtually) concatenated input, without materializing the
    # concat: two MXU matmuls accumulated into one f32 result.
    h = jnp.dot(x1_ref[...], w1a_ref[...], preferred_element_type=jnp.float32)
    h = h + jnp.dot(x2_ref[...], w1b_ref[...], preferred_element_type=jnp.float32)
    h = h + b1_ref[...]          # bias add on the f32 accumulator
    h = jnp.maximum(h, 0.0)      # ReLU on the f32 accumulator (VPU)
    # fc2: cast the activation to the weight dtype for the MXU, accumulate f32.
    y = jnp.dot(h.astype(w2_ref.dtype), w2_ref[...],
                preferred_element_type=jnp.float32) + b2_ref[...]
    o_ref[...] = y.astype(o_ref.dtype)


def merge_layer(x1, x2, w1, b1, w2, b2, *, block_b=512, compute_dtype=None,
                vmem_limit_bytes=None):
    """y = relu(concat(x1, x2, axis=1) @ w1 + b1) @ w2 + b2  via Pallas."""
    B, dim1 = x1.shape
    dim2 = x2.shape[1]
    d12, d3 = w1.shape
    d4 = w2.shape[1]
    assert d12 == dim1 + dim2 and w2.shape[0] == d3
    out_dtype = x1.dtype

    if compute_dtype is not None:
        x1 = x1.astype(compute_dtype)
        x2 = x2.astype(compute_dtype)
        w1 = w1.astype(compute_dtype)
        w2 = w2.astype(compute_dtype)

    # Pre-split fc1's weight so the kernel never concatenates along the lane axis.
    w1a = w1[:dim1]
    w1b = w1[dim1:]
    # Biases kept in f32 as (1, dN) resident VMEM refs (added once per tile).
    b1 = b1.astype(jnp.float32).reshape(1, d3)
    b2 = b2.astype(jnp.float32).reshape(1, d4)

    # Batch tile: multiple of the sublane packing (16 rows for 16-bit dtypes,
    # 8 for f32), capped so double-buffered activations + resident weights fit
    # comfortably in scoped VMEM on every generation (incl. v7x's 64 MiB).
    row_mult = 16 if jnp.dtype(x1.dtype).itemsize == 2 else 8
    tb = min(block_b, _round_up(B, row_mult))
    tb = _round_up(tb, row_mult)
    b_pad = _round_up(B, tb)
    if b_pad != B:
        x1 = jnp.pad(x1, ((0, b_pad - B), (0, 0)))
        x2 = jnp.pad(x2, ((0, b_pad - B), (0, 0)))
    grid = (b_pad // tb,)

    batch_spec = lambda cols: pl.BlockSpec((tb, cols), lambda i: (i, 0))
    resident = lambda shape: pl.BlockSpec(shape, lambda i: (0, 0))

    out = pl.pallas_call(
        merge_layer_kernel,
        out_shape=jax.ShapeDtypeStruct((b_pad, d4), out_dtype),
        grid=grid,
        in_specs=[
            batch_spec(dim1),       # x1 tile      (batch-indexed)
            batch_spec(dim2),       # x2 tile      (batch-indexed)
            resident(w1a.shape),    # w1[:dim1]    (resident)
            resident(w1b.shape),    # w1[dim1:]    (resident)
            resident(b1.shape),     # b1           (resident)
            resident(w2.shape),     # w2           (resident)
            resident(b2.shape),     # b2           (resident)
        ],
        out_specs=batch_spec(d4),
        compiler_params=pltpu.CompilerParams(
            dimension_semantics=("parallel",),   # megacore / v7x 2-TC sharding
            vmem_limit_bytes=vmem_limit_bytes,
        ),
    )(x1, x2, w1a, w1b, b1, w2, b2)

    return out[:B] if b_pad != B else out
    # TODO(synk): if d4 << 128 ever shows up as a store bottleneck, pad w2/b2 to
    # 128 output lanes in the wrapper and slice the result in JAX.


def init_params(key, dim1, dim2, dim3, dim4, dtype=jnp.float32):
    """Deterministic init mirroring the module's __init__ shapes.

    fc1: Linear(dim1+dim2, dim3), xavier_normal weight
    fc2: Linear(dim3, dim4),      xavier_normal weight
    biases: PyTorch Linear default U(-1/sqrt(fan_in), 1/sqrt(fan_in))
    Weights are returned already transposed to [in, out] for the kernel.
    """
    k1, k2, k3, k4 = jax.random.split(key, 4)
    fan_in1, fan_out1 = dim1 + dim2, dim3
    fan_in2, fan_out2 = dim3, dim4
    std1 = (2.0 / (fan_in1 + fan_out1)) ** 0.5
    std2 = (2.0 / (fan_in2 + fan_out2)) ** 0.5
    w1 = (jax.random.normal(k1, (fan_in1, fan_out1)) * std1).astype(dtype)
    w2 = (jax.random.normal(k2, (fan_in2, fan_out2)) * std2).astype(dtype)
    bound1 = 1.0 / (fan_in1 ** 0.5)
    bound2 = 1.0 / (fan_in2 ** 0.5)
    b1 = jax.random.uniform(k3, (fan_out1,), minval=-bound1, maxval=bound1).astype(dtype)
    b2 = jax.random.uniform(k4, (fan_out2,), minval=-bound2, maxval=bound2).astype(dtype)
    return w1, b1, w2, b2


if __name__ == "__main__":
    key = jax.random.PRNGKey(0)
    kx1, kx2, kp, kx3, kx4 = jax.random.split(key, 5)

    # small shapes consistent with the module's forward: x1:[B,dim1], x2:[B,dim2]
    B, dim1, dim2, dim3, dim4 = 8, 16, 16, 32, 8
    x1 = jax.random.normal(kx1, (B, dim1), dtype=jnp.float32)
    x2 = jax.random.normal(kx2, (B, dim2), dtype=jnp.float32)
    w1, b1, w2, b2 = init_params(kp, dim1, dim2, dim3, dim4)

    ref = jnp.maximum(jnp.concatenate([x1, x2], axis=1) @ w1 + b1, 0.0) @ w2 + b2

    # f32 path, exact-ish check
    out = jax.block_until_ready(merge_layer(x1, x2, w1, b1, w2, b2))
    assert out.shape == (B, dim4)
    assert jnp.allclose(out, ref, atol=1e-5, rtol=1e-5)

    # batch not a multiple of the tile (exercises padding + batch grid)
    B2 = 37
    x1b = jax.random.normal(kx3, (B2, dim1), dtype=jnp.float32)
    x2b = jax.random.normal(kx4, (B2, dim2), dtype=jnp.float32)
    refb = jnp.maximum(jnp.concatenate([x1b, x2b], axis=1) @ w1 + b1, 0.0) @ w2 + b2
    outb = jax.block_until_ready(merge_layer(x1b, x2b, w1, b1, w2, b2, block_b=16))
    assert outb.shape == (B2, dim4)
    assert jnp.allclose(outb, refb, atol=1e-5, rtol=1e-5)

    # bf16 MXU path with f32 accumulation (looser tolerance)
    out_bf16 = jax.block_until_ready(
        merge_layer(x1, x2, w1, b1, w2, b2, compute_dtype=jnp.bfloat16))
    assert out_bf16.shape == (B, dim4)
    assert jnp.allclose(out_bf16, ref, atol=5e-2, rtol=5e-2)

    print("KERNEL_OK")
</pallas_src>

<mosaic_0001>
module attributes {stable_mosaic.version = 11 : i64} {
  func.func @merge_layer_kernel(%arg0: i32, %arg1: memref<8x16xf32, #tpu.memory_space<vmem>>, %arg2: memref<8x16xf32, #tpu.memory_space<vmem>>, %arg3: memref<16x32xf32, #tpu.memory_space<vmem>>, %arg4: memref<16x32xf32, #tpu.memory_space<vmem>>, %arg5: memref<1x32xf32, #tpu.memory_space<vmem>>, %arg6: memref<32x8xf32, #tpu.memory_space<vmem>>, %arg7: memref<1x8xf32, #tpu.memory_space<vmem>>, %arg8: memref<8x8xf32, #tpu.memory_space<vmem>>) attributes {dimension_semantics = [#tpu.dimension_semantics<parallel>], iteration_bounds = array<i64: 1>, scalar_prefetch = 0 : i64, scratch_operands = 0 : i64, tpu.core_type = #tpu.core_type<tc>, window_params = [{transform_indices = @transform_0, window_bounds = array<i64: 8, 16>}, {transform_indices = @transform_1, window_bounds = array<i64: 8, 16>}, {pipeline_mode = #tpu.pipeline_mode<synchronous>, transform_indices = @transform_2, window_bounds = array<i64: 16, 32>}, {pipeline_mode = #tpu.pipeline_mode<synchronous>, transform_indices = @transform_3, window_bounds = array<i64: 16, 32>}, {pipeline_mode = #tpu.pipeline_mode<synchronous>, transform_indices = @transform_4, window_bounds = array<i64: 1, 32>}, {pipeline_mode = #tpu.pipeline_mode<synchronous>, transform_indices = @transform_5, window_bounds = array<i64: 32, 8>}, {pipeline_mode = #tpu.pipeline_mode<synchronous>, transform_indices = @transform_6, window_bounds = array<i64: 1, 8>}, {transform_indices = @transform_7, window_bounds = array<i64: 8, 8>}]} {
    %c0 = arith.constant 0 : index
    %c0_0 = arith.constant 0 : index
    %0 = vector.load %arg1[%c0, %c0_0] : memref<8x16xf32, #tpu.memory_space<vmem>>, vector<8x16xf32>
    %c0_1 = arith.constant 0 : index
    %c0_2 = arith.constant 0 : index
    %1 = vector.load %arg3[%c0_1, %c0_2] : memref<16x32xf32, #tpu.memory_space<vmem>>, vector<16x32xf32>
    %cst = arith.constant dense<0.000000e+00> : vector<8x32xf32>
    %2 = tpu.matmul %0, %1, %cst {dimension_numbers = #tpu.dot_dimension_numbers<[1], [0], [0], [1], [0, 0, 1, 1], [], []>} : vector<8x16xf32>, vector<16x32xf32>, vector<8x32xf32> -> vector<8x32xf32>
    %c0_3 = arith.constant 0 : index
    %c0_4 = arith.constant 0 : index
    %3 = vector.load %arg2[%c0_3, %c0_4] : memref<8x16xf32, #tpu.memory_space<vmem>>, vector<8x16xf32>
    %c0_5 = arith.constant 0 : index
    %c0_6 = arith.constant 0 : index
    %4 = vector.load %arg4[%c0_5, %c0_6] : memref<16x32xf32, #tpu.memory_space<vmem>>, vector<16x32xf32>
    %cst_7 = arith.constant dense<0.000000e+00> : vector<8x32xf32>
    %5 = tpu.matmul %3, %4, %cst_7 {dimension_numbers = #tpu.dot_dimension_numbers<[1], [0], [0], [1], [0, 0, 1, 1], [], []>} : vector<8x16xf32>, vector<16x32xf32>, vector<8x32xf32> -> vector<8x32xf32>
    %6 = arith.addf %2, %5 : vector<8x32xf32>
    %c0_8 = arith.constant 0 : index
    %c0_9 = arith.constant 0 : index
    %7 = vector.load %arg5[%c0_8, %c0_9] : memref<1x32xf32, #tpu.memory_space<vmem>>, vector<1x32xf32>
    %8 = vector.broadcast %7 : vector<1x32xf32> to vector<8x32xf32>
    %9 = arith.addf %6, %8 : vector<8x32xf32>
    %cst_10 = arith.constant 0.000000e+00 : f32
    %10 = vector.broadcast %cst_10 : f32 to vector<8x32xf32>
    %11 = arith.maximumf %9, %10 : vector<8x32xf32>
    %c0_11 = arith.constant 0 : index
    %c0_12 = arith.constant 0 : index
    %12 = vector.load %arg6[%c0_11, %c0_12] : memref<32x8xf32, #tpu.memory_space<vmem>>, vector<32x8xf32>
    %cst_13 = arith.constant dense<0.000000e+00> : vector<8x8xf32>
    %13 = tpu.matmul %11, %12, %cst_13 {dimension_numbers = #tpu.dot_dimension_numbers<[1], [0], [0], [1], [0, 0, 1, 1], [], []>} : vector<8x32xf32>, vector<32x8xf32>, vector<8x8xf32> -> vector<8x8xf32>
    %c0_14 = arith.constant 0 : index
    %c0_15 = arith.constant 0 : index
    %14 = vector.load %arg7[%c0_14, %c0_15] : memref<1x8xf32, #tpu.memory_space<vmem>>, vector<1x8xf32>
    %15 = vector.broadcast %14 : vector<1x8xf32> to vector<8x8xf32>
    %16 = arith.addf %13, %15 : vector<8x8xf32>
    %c0_16 = arith.constant 0 : index
    %c0_17 = arith.constant 0 : index
    %17 = vector.load %arg8[%c0_16, %c0_17] : memref<8x8xf32, #tpu.memory_space<vmem>>, vector<8x8xf32>
    tpu.vector_store %arg8[%c0_16, %c0_17], %16 {strides = array<i32>} : memref<8x8xf32, #tpu.memory_space<vmem>>, vector<8x8xf32>,
    return
  }
  func.func @transform_0(%arg0: i32) -> (i32, i32) {
    %c0_i32 = arith.constant 0 : i32
    %c0_i32_0 = arith.constant 0 : i32
    return %arg0, %c0_i32 : i32, i32
  }
  func.func @transform_1(%arg0: i32) -> (i32, i32) {
    %c0_i32 = arith.constant 0 : i32
    %c0_i32_0 = arith.constant 0 : i32
    return %arg0, %c0_i32 : i32, i32
  }
  func.func @transform_2(%arg0: i32) -> (i32, i32) {
    %c0_i32 = arith.constant 0 : i32
    %c0_i32_0 = arith.constant 0 : i32
    %c0_i32_1 = arith.constant 0 : i32
    return %c0_i32, %c0_i32_0 : i32, i32
  }
  func.func @transform_3(%arg0: i32) -> (i32, i32) {
    %c0_i32 = arith.constant 0 : i32
    %c0_i32_0 = arith.constant 0 : i32
    %c0_i32_1 = arith.constant 0 : i32
    return %c0_i32, %c0_i32_0 : i32, i32
  }
  func.func @transform_4(%arg0: i32) -> (i32, i32) {
    %c0_i32 = arith.constant 0 : i32
    %c0_i32_0 = arith.constant 0 : i32
    %c0_i32_1 = arith.constant 0 : i32
    return %c0_i32, %c0_i32_0 : i32, i32
  }
  func.func @transform_5(%arg0: i32) -> (i32, i32) {
    %c0_i32 = arith.constant 0 : i32
    %c0_i32_0 = arith.constant 0 : i32
    %c0_i32_1 = arith.constant 0 : i32
    return %c0_i32, %c0_i32_0 : i32, i32
  }
  func.func @transform_6(%arg0: i32) -> (i32, i32) {
    %c0_i32 = arith.constant 0 : i32
    %c0_i32_0 = arith.constant 0 : i32
    %c0_i32_1 = arith.constant 0 : i32
    return %c0_i32, %c0_i32_0 : i32, i32
  }
  func.func @transform_7(%arg0: i32) -> (i32, i32) {
    %c0_i32 = arith.constant 0 : i32
    %c0_i32_0 = arith.constant 0 : i32
    return %arg0, %c0_i32 : i32, i32
  }
}

</mosaic_0001>

<bundles_post_ra>
// kernel: tpu_custom_call.1
= control target key start
LH: loop header
LB: loop body
LE: loop exit
PB: predicated region body
PF: predicated region fallthrough
CT: control target
= control target key end

     0   :  { %12 = vsyncpa [#allocation3], 0  ;;  %s514_s0 = inlined_call_operand.vmem [shape: f32[8,16], index: 0, kind: input, shape index: {}]   ;;  %s515_s1 = inlined_call_operand.hbm [shape: f32[8,16], index: 1, kind: input, shape index: {}]   ;;  %s516_s2 = inlined_call_operand.vmem [shape: f32[16,32], index: 2, kind: input, shape index: {}]   ;;  %s517_s3 = inlined_call_operand.vmem [shape: f32[16,32], index: 3, kind: input, shape index: {}]   ;;  %s518_s4 = inlined_call_operand.vmem [shape: f32[1,32], index: 4, kind: input, shape index: {}]   ;;  %s519_s5 = inlined_call_operand.vmem [shape: f32[32,8], index: 5, kind: input, shape index: {}]   ;;  %s520_s6 = inlined_call_operand.vmem [shape: f32[1,8], index: 6, kind: input, shape index: {}]   ;;  %s521_s7 = inlined_call_operand.hbm [shape: f32[8,8], index: 7, kind: output, shape index: {}]  }
   0x1   :  { %13 = vsyncpa [#allocation4], 0  ;;  %s409_s24 = smov [#allocation2]   ;;  %s361_s28 = scalar_lea.hbm %s515_s1, 128 }
   0x2   :  { %s22_s25 = sshll.u32 %s409_s24, 4  ;;  %p362_p0 = scmp.ne.s32.totalorder %s515_s1, %s361_s28  ;;  %s23_s25 = int_to_ptr.vmem [resolvable:$true] %s22_s25 }
   0x3   :  { %p365_p1 = scmp.lt.u32.totalorder %s361_s28, %s515_s1 }
   0x5   :  { %p367_p2 = pnand %p365_p1, %p362_p0 }
   0x7   :  { %370 = shalt.err (!%p367_p2)
}
   0x8   :  { %s371_s10 = scalar_lea.vmem %s23_s25, 128  ;;  %p376_p4 = scmp.lt.s32.totalorder %s23_s25, %s23_s25 }
   0x9   :  { %p372_p3 = scmp.ne.s32.totalorder %s23_s25, %s371_s10  ;;  %p377_p5 = scmp.lt.s32.totalorder %s371_s10, %s371_s10 }
   0xb   :  { %p378_p6 = por %p377_p5, %p376_p4 }
   0xd   :  { %p379_p7 = pnand %p378_p6, %p372_p3 }
   0xf   :  { %382 = shalt.err (!%p379_p7)
}
  0x10   :  { %25 = dma.hbm_to_vmem [thread:$0]  %s515_s1, 128, %s23_s25, [#allocation3]  }
  0x11   :  { %405 = dma.done.wait [#allocation3], 128  }
  0x12   :  { %406 = vsyncadd [#allocation3], 4294967168  ;;  %v410_v0 = vmov 0.0|0.0   ;;  %vm411_vm0 = vmmov 0   ;;  %v412_v1 = vmov 0.0   ;;  %v43_v2 = vld [vmem:[%s517_s3] sm:$0xff] }
  0x13   :  { %344 = vmatprep.subr.bf16.mxu1 %v410_v0  ;;  %323 = vmatprep.mubr.msk.f32.mxu1 %vm411_vm0, %v412_v1  ;;  %v44_v3 = vld [vmem:[%s517_s3 + $0x8] sm:$0xff]  ;;  %v40_v5 = vld [vmem:[%s516_s2] sm:$0xff]  ;;  %vm45_vm1 = vcmask 130048   ;;  %v203_v13 = vld [vmem:[%s519_s5 + $0x10] sm:$0xff]  ;;  %vm212_vm2 = vcmask 261120   ;;  %vm286_vm3 = vcmask 64512  }
  0x14   :  { %350 = vmatprep.subr.bf16.mxu0 %v410_v0  ;;  %341 = vmatprep.mubr.msk.f32.mxu0 %vm411_vm0, %v412_v1  ;;  %v345_v4 = vpack.c.bf16 %v44_v3, %v43_v2  ;;  %v41_v6 = vld [vmem:[%s516_s2 + $0x8] sm:$0xff]  ;;  %v42_v7 = vld [vmem:[#allocation2] sm:$0xff]  ;;  %v204_v14 = vld [vmem:[%s519_s5 + $0x18] sm:$0xff] }
  0x15   :  { %v348_v8 = vpack.c.bf16 %v41_v6, %v40_v5  ;;  %v39_v9 = vld [vmem:[%s514_s0] sm:$0xff]  ;;  %v202_v11 = vld [vmem:[%s519_s5 + $0x8] sm:$0xff]  ;;  %v354_v15 = vpack.c.bf16 %v204_v14, %v203_v13 }
  0x16   :  { %346 = vmatpush3.bf16.msra.mxu1 %v345_v4  ;;  %v201_v10 = vld [vmem:[%s519_s5] sm:$0xff]  ;;  %s413_s5 = smov [#allocation5]  }
  0x17   :  { %347 = vmatprep.subr.bf16.mxu1 %v410_v0  ;;  %v351_v12 = vpack.c.bf16 %v202_v11, %v201_v10  ;;  %v305_v19 = vld [vmem:[%s518_s4] ss:$0 sm:$0xff]  ;;  %s294_s8 = sshll.u32 %s413_s5, 4  ;;  %s295_s8 = int_to_ptr.vmem [resolvable:$true] %s294_s8 }
  0x18   :  { %v306_v24 = vld [vmem:[%s520_s6] ss:$0 sm:$0xff]  ;;  %s383_s9 = scalar_lea.vmem %s295_s8, 128  ;;  %p388_p9 = scmp.lt.s32.totalorder %s295_s8, %s295_s8 }
  0x19   :  { %324 = vmatmul.mubr.msk.f32.vlgmr.msra.gmra.mrb[0].mxu1 %vm45_vm1, %v42_v7  ;;  %352 = vmatpush3.bf16.msra.mxu0 %v351_v12  ;;  %p384_p8 = scmp.ne.s32.totalorder %s295_s8, %s383_s9  ;;  %p389_p10 = scmp.lt.s32.totalorder %s383_s9, %s383_s9 }
  0x1a   :  { %349 = vmatpush3.bf16.msra.mxu1 %v348_v8  ;;  %330 = vmatprep.mubr.msk.f32.mxu1 %vm411_vm0, %v412_v1 }
  0x1b   :  { %353 = vmatprep.subr.bf16.mxu0 %v410_v0  ;;  %p390_p11 = por %p389_p10, %p388_p9 }
  0x1d   :  { %331 = vmatmul.mubr.msk.f32.vlgmr.msra.gmra.mrb[2].mxu1 %vm45_vm1, %v39_v9  ;;  %355 = vmatpush3.bf16.msra.mxu0 %v354_v15  ;;  %p391_p12 = pnand %p390_p11, %p384_p8 }
  0xec   :  { %v115_v16 = vpop.f32.mrb[0].mxu1 }
  0xed   :  { %v325_v17 = vpop.f32.mrb[1].mxu1 }
  0xf0   :  { %v188_v18 = vpop.f32.mrb[2].mxu1 }
  0xf1   :  { %v189_v20 = vadd.f32 %v188_v18, %v115_v16  ;;  %v332_v21 = vpop.f32.mrb[3].mxu1 }
  0xf3   :  { %v199_v22 = vadd.f32 %v305_v19, %v189_v20 }
  0xf5   :  { %v200_v23 = vmax.f32 %v199_v22, 0.0 }
  0xf7   :  { %342 = vmatmul.mubr.msk.f32.vlgmr.msra.gmra.mrb[0].mxu0 %vm212_vm2, %v200_v23 }
 0x1ca   :  { %v282_v25 = vpop.f32.mrb[0].mxu0 }
 0x1cb   :  { %v283_v26 = vadd.f32 %v306_v24, %v282_v25  ;;  %v343_v27 = vpop.f32.mrb[1].mxu0 }
 0x1cd   :  { %287 = vst.msk [vmem:[#allocation5] sm:$0xff] %vm286_vm3, %v283_v26 }
 0x1ce   :  { %394 = shalt.err (!%p391_p12)
}
 0x1cf   :  { %s395_s11 = scalar_lea.hbm %s521_s7, 128 }
 0x1d0   :  { %p396_p13 = scmp.ne.s32.totalorder %s521_s7, %s395_s11  ;;  %p399_p0 = scmp.lt.u32.totalorder %s395_s11, %s521_s7 }
 0x1d2   :  { %p401_p1 = pnand %p399_p0, %p396_p13 }
 0x1d4   :  { %404 = shalt.err (!%p401_p1)
}
 0x1d5   :  { %297 = dma.vmem_to_hbm [thread:$0]  %s295_s8, 128, %s521_s7, [#allocation4]  }
 0x1d6   :  { %407 = dma.done.wait [#allocation4], 128  }
 0x1d7   :  { %408 = vsyncadd [#allocation4], 4294967168 }
 0x1d8   :  { %301 = vsyncpa [#allocation3], 1 }
 0x1d9   :  { %302 = vsyncpa [#allocation4], 1 }

</bundles_post_ra>
